<compile_context>
chip_gen: v7x
topology: tpu7x:2x2x1
jax: 0.10.0
libtpu: 0.0.40
codegen_flags: <defaults>
</compile_context>

<pallas_src>
import functools

import jax
import jax.numpy as jnp
from jax.experimental import pallas as pl
from jax.experimental.pallas import tpu as pltpu

_NUM_CORE_SPLITS = 2   # shard the D-reduction across up to 2 TensorCores (v7x)
_OUT_SUBLANES = 8      # output row-block height -> (8, 128)-aligned output tile


def _round_up(x, m):
    return (x + m - 1) // m * m


def _capsule_loss_kernel(labels_ref, classes_ref, img_ref, rec_ref, out_ref,
                         acc_ref, margin_ref, *, batch):
    c = pl.program_id(0)            # core-split index over D
    k = pl.program_id(1)            # tile index along D within this split
    nk = pl.num_programs(1)

    # ---- init per split-group -------------------------------------------------
    @pl.when(k == 0)
    def _init():
        acc_ref[...] = jnp.zeros_like(acc_ref)
        margin_ref[0, 0] = jnp.float32(0.0)

    # ---- margin loss: tiny [B, NUM_CLASSES] work, done exactly once -----------
    @pl.when(jnp.logical_and(k == 0, c == 0))
    def _margin():
        labels = labels_ref[...].astype(jnp.float32)
        cls = classes_ref[...].astype(jnp.float32)
        left = jnp.maximum(0.9 - cls, 0.0)
        right = jnp.maximum(cls - 0.1, 0.0)
        margin_ref[0, 0] = jnp.sum(
            labels * left * left + 0.5 * (1.0 - labels) * right * right)

    # ---- reconstruction SSE for this tile (cast in-kernel, accumulate in f32) -
    diff = rec_ref[...].astype(jnp.float32) - img_ref[...].astype(jnp.float32)
    # Two-stage reduce: sublane reduce now (keeps a lane-dense partial on the
    # VPU path), single cross-lane reduce deferred to the epilogue.
    acc_ref[...] += jnp.sum(diff * diff, axis=0, keepdims=True)

    # ---- epilogue: final cross-lane reduce + combine ---------------------------
    @pl.when(k == nk - 1)
    def _finish():
        recon = jnp.sum(acc_ref[...])
        val = (margin_ref[0, 0] + jnp.float32(0.0005) * recon) / jnp.float32(batch)
        # Lane-dense full-tile store; wrapper reads element [0, 0] of each split.
        out_ref[...] = jnp.full(out_ref.shape, val, dtype=jnp.float32)


def capsule_loss(images, labels, classes, reconstructions):
    """images: [B, C, H, W]; labels/classes: [B, NC]; reconstructions: [B, C*H*W]."""
    B, D = reconstructions.shape
    assert images.size == reconstructions.size
    images_flat = images.reshape(B, -1)     # native dtype; cast happens in-kernel

    # Lane-dense tile along D, capped so one (B, td) f32 block is <= ~2 MiB
    # (keeps 2 inputs x 2 pipeline buffers comfortably inside v7x's VMEM).
    max_tile_bytes = 2 * 1024 * 1024
    td_cap = max(128, min(4096, (max_tile_bytes // (B * 4)) // 128 * 128))
    td = min(td_cap, _round_up(pl.cdiv(D, _NUM_CORE_SPLITS), 128))
    d_pad = _round_up(D, _NUM_CORE_SPLITS * td)
    if d_pad != D:
        pad = ((0, 0), (0, d_pad - D))
        # Zero padding on BOTH tensors -> contributes exactly 0 to the SSE.
        images_flat = jnp.pad(images_flat, pad)
        reconstructions = jnp.pad(reconstructions, pad)
    num_k = d_pad // (_NUM_CORE_SPLITS * td)

    img_bytes = jnp.dtype(images_flat.dtype).itemsize
    rec_bytes = jnp.dtype(reconstructions.dtype).itemsize
    cost = pl.CostEstimate(
        flops=int(3 * B * d_pad + 8 * labels.size),
        transcendentals=0,
        bytes_accessed=int(B * d_pad * (img_bytes + rec_bytes) + 2 * labels.size * 4),
    )

    kernel = functools.partial(_capsule_loss_kernel, batch=B)

    out = pl.pallas_call(
        kernel,
        out_shape=jax.ShapeDtypeStruct(
            (_NUM_CORE_SPLITS * _OUT_SUBLANES, 128), jnp.float32),
        grid=(_NUM_CORE_SPLITS, num_k),
        in_specs=[
            # Tiny [B, NC] operands: single full-array block, constant index
            # -> fetched once, never re-DMA'd across the reduction grid.
            pl.BlockSpec(labels.shape, lambda c, k: (0, 0)),
            pl.BlockSpec(classes.shape, lambda c, k: (0, 0)),
            # Big operands: tiled along D, auto double-buffered pipeline.
            pl.BlockSpec((B, td), lambda c, k: (0, c * num_k + k)),
            pl.BlockSpec((B, td), lambda c, k: (0, c * num_k + k)),
        ],
        out_specs=pl.BlockSpec((_OUT_SUBLANES, 128), lambda c, k: (c, 0)),
        scratch_shapes=[
            pltpu.VMEM((1, td), jnp.float32),   # lane-dense SSE accumulator
            pltpu.SMEM((1, 1), jnp.float32),    # margin-loss scalar
        ],
        compiler_params=pltpu.CompilerParams(
            dimension_semantics=("parallel", "arbitrary"),
            vmem_limit_bytes=32 * 1024 * 1024,
        ),
        cost_estimate=cost,
    )(labels, classes, images_flat, reconstructions)

    # One partial per core-split sits at row c*_OUT_SUBLANES, lane 0.
    partials = out.reshape(_NUM_CORE_SPLITS, _OUT_SUBLANES, 128)[:, 0, 0]
    return jnp.sum(partials)


def capsule_loss_ref(images, labels, classes, reconstructions):
    """Pure-JAX reference for verification."""
    B = reconstructions.shape[0]
    left = jnp.maximum(0.9 - classes, 0.0) ** 2
    right = jnp.maximum(classes - 0.1, 0.0) ** 2
    margin = jnp.sum(labels * left + 0.5 * (1.0 - labels) * right)
    img = images.reshape(B, -1)
    recon = jnp.sum((reconstructions - img) ** 2)
    return (margin + 0.0005 * recon) / B


if __name__ == "__main__":
    key = jax.random.PRNGKey(0)
    k1, k2, k3, k4 = jax.random.split(key, 4)

    B, C, H, W = 2, 4, 16, 16
    NUM_CLASSES = 10
    D = C * H * W

    images = jax.random.uniform(k1, (B, C, H, W), dtype=jnp.float32)
    # one-hot labels
    label_idx = jax.random.randint(k2, (B,), 0, NUM_CLASSES)
    labels = jax.nn.one_hot(label_idx, NUM_CLASSES, dtype=jnp.float32)
    # class probabilities in [0, 1]
    classes = jax.nn.sigmoid(jax.random.normal(k3, (B, NUM_CLASSES), dtype=jnp.float32))
    reconstructions = jax.random.uniform(k4, (B, D), dtype=jnp.float32)

    loss = capsule_loss(images, labels, classes, reconstructions)
    jax.block_until_ready(loss)

    ref = capsule_loss_ref(images, labels, classes, reconstructions)
    assert jnp.allclose(loss, ref, rtol=1e-5, atol=1e-5), (loss, ref)

    print("KERNEL_OK")
</pallas_src>

<mosaic_0001>
module attributes {stable_mosaic.version = 11 : i64} {
  func.func @_capsule_loss_kernel(%arg0: i32, %arg1: i32, %arg2: memref<2x10xf32, #tpu.memory_space<vmem>>, %arg3: memref<2x10xf32, #tpu.memory_space<vmem>>, %arg4: memref<2x512xf32, #tpu.memory_space<vmem>>, %arg5: memref<2x512xf32, #tpu.memory_space<vmem>>, %arg6: memref<8x128xf32, #tpu.memory_space<vmem>>, %arg7: memref<1x512xf32, #tpu.memory_space<vmem>>, %arg8: memref<1x1xf32, #tpu.memory_space<smem>>) attributes {dimension_semantics = [#tpu.dimension_semantics<parallel>, #tpu.dimension_semantics<arbitrary>], iteration_bounds = array<i64: 2, 1>, scalar_prefetch = 0 : i64, scratch_operands = 2 : i64, tpu.core_type = #tpu.core_type<tc>, window_params = [{pipeline_mode = #tpu.pipeline_mode<synchronous>, transform_indices = @transform_0, window_bounds = array<i64: 2, 10>}, {pipeline_mode = #tpu.pipeline_mode<synchronous>, transform_indices = @transform_1, window_bounds = array<i64: 2, 10>}, {transform_indices = @transform_2, window_bounds = array<i64: 2, 512>}, {transform_indices = @transform_3, window_bounds = array<i64: 2, 512>}, {transform_indices = @transform_4, window_bounds = array<i64: 8, 128>}]} {
    %c0_i32 = arith.constant 0 : i32
    %0 = arith.cmpi eq, %arg1, %c0_i32 : i32
    %1 = arith.extui %0 : i1 to i32
    %c0_i32_0 = arith.constant 0 : i32
    %2 = arith.cmpi ne, %1, %c0_i32_0 : i32
    scf.if %2 {
      %cst_13 = arith.constant 0.000000e+00 : f32
      %20 = vector.broadcast %cst_13 : f32 to vector<1x512xf32>
      %c0_14 = arith.constant 0 : index
      %c0_15 = arith.constant 0 : index
      %21 = vector.load %arg7[%c0_14, %c0_15] : memref<1x512xf32, #tpu.memory_space<vmem>>, vector<1x512xf32>
      tpu.vector_store %arg7[%c0_14, %c0_15], %20 {strides = array<i32>} : memref<1x512xf32, #tpu.memory_space<vmem>>, vector<1x512xf32>,
      %cst_16 = arith.constant 0.000000e+00 : f32
      %c0_17 = arith.constant 0 : index
      %c0_18 = arith.constant 0 : index
      %22 = memref.load %arg8[%c0_17, %c0_18] : memref<1x1xf32, #tpu.memory_space<smem>>
      memref.store %cst_16, %arg8[%c0_17, %c0_18] : memref<1x1xf32, #tpu.memory_space<smem>>
    } else {
    }
    %c0_i32_1 = arith.constant 0 : i32
    %3 = arith.cmpi eq, %arg1, %c0_i32_1 : i32
    %c0_i32_2 = arith.constant 0 : i32
    %4 = arith.cmpi eq, %arg0, %c0_i32_2 : i32
    %5 = arith.andi %3, %4 : i1
    %6 = arith.extui %5 : i1 to i32
    %c0_i32_3 = arith.constant 0 : i32
    %7 = arith.cmpi ne, %6, %c0_i32_3 : i32
    scf.if %7 {
      %c0_13 = arith.constant 0 : index
      %c0_14 = arith.constant 0 : index
      %20 = vector.load %arg2[%c0_13, %c0_14] : memref<2x10xf32, #tpu.memory_space<vmem>>, vector<2x10xf32>
      %c0_15 = arith.constant 0 : index
      %c0_16 = arith.constant 0 : index
      %21 = vector.load %arg3[%c0_15, %c0_16] : memref<2x10xf32, #tpu.memory_space<vmem>>, vector<2x10xf32>
      %cst_17 = arith.constant 0.899999976 : f32
      %22 = vector.broadcast %cst_17 : f32 to vector<2x10xf32>
      %23 = arith.subf %22, %21 : vector<2x10xf32>
      %cst_18 = arith.constant 0.000000e+00 : f32
      %24 = vector.broadcast %cst_18 : f32 to vector<2x10xf32>
      %25 = arith.maximumf %23, %24 : vector<2x10xf32>
      %cst_19 = arith.constant 1.000000e-01 : f32
      %26 = vector.broadcast %cst_19 : f32 to vector<2x10xf32>
      %27 = arith.subf %21, %26 : vector<2x10xf32>
      %cst_20 = arith.constant 0.000000e+00 : f32
      %28 = vector.broadcast %cst_20 : f32 to vector<2x10xf32>
      %29 = arith.maximumf %27, %28 : vector<2x10xf32>
      %30 = arith.mulf %20, %25 : vector<2x10xf32>
      %31 = arith.mulf %30, %25 : vector<2x10xf32>
      %cst_21 = arith.constant 1.000000e+00 : f32
      %32 = vector.broadcast %cst_21 : f32 to vector<2x10xf32>
      %33 = arith.subf %32, %20 : vector<2x10xf32>
      %cst_22 = arith.constant 5.000000e-01 : f32
      %34 = vector.broadcast %cst_22 : f32 to vector<2x10xf32>
      %35 = arith.mulf %34, %33 : vector<2x10xf32>
      %36 = arith.mulf %35, %29 : vector<2x10xf32>
      %37 = arith.mulf %36, %29 : vector<2x10xf32>
      %38 = arith.addf %31, %37 : vector<2x10xf32>
      %39 = vector.shape_cast %38 : vector<2x10xf32> to vector<1x2x10xf32>
      %cst_23 = arith.constant dense<0.000000e+00> : vector<1xf32>
      %40 = vector.multi_reduction <add>, %39, %cst_23 [1, 2] : vector<1x2x10xf32> to vector<1xf32>
      %41 = vector.shape_cast %40 : vector<1xf32> to vector<1x1x1xf32>
      %42 = vector.extract %41[0, 0, 0] : f32 from vector<1x1x1xf32>
      %c0_24 = arith.constant 0 : index
      %c0_25 = arith.constant 0 : index
      %43 = memref.load %arg8[%c0_24, %c0_25] : memref<1x1xf32, #tpu.memory_space<smem>>
      memref.store %42, %arg8[%c0_24, %c0_25] : memref<1x1xf32, #tpu.memory_space<smem>>
    } else {
    }
    %c0 = arith.constant 0 : index
    %c0_4 = arith.constant 0 : index
    %8 = vector.load %arg5[%c0, %c0_4] : memref<2x512xf32, #tpu.memory_space<vmem>>, vector<2x512xf32>
    %c0_5 = arith.constant 0 : index
    %c0_6 = arith.constant 0 : index
    %9 = vector.load %arg4[%c0_5, %c0_6] : memref<2x512xf32, #tpu.memory_space<vmem>>, vector<2x512xf32>
    %10 = arith.subf %8, %9 : vector<2x512xf32>
    %c0_7 = arith.constant 0 : index
    %c0_8 = arith.constant 0 : index
    %11 = vector.load %arg7[%c0_7, %c0_8] : memref<1x512xf32, #tpu.memory_space<vmem>>, vector<1x512xf32>
    %12 = arith.mulf %10, %10 : vector<2x512xf32>
    %cst = arith.constant dense<0.000000e+00> : vector<512xf32>
    %13 = vector.multi_reduction <add>, %12, %cst [0] : vector<2x512xf32> to vector<512xf32>
    %14 = vector.shape_cast %13 : vector<512xf32> to vector<1x512xf32>
    %15 = arith.addf %11, %14 : vector<1x512xf32>
    %c0_9 = arith.constant 0 : index
    %c0_10 = arith.constant 0 : index
    %16 = vector.load %arg7[%c0_9, %c0_10] : memref<1x512xf32, #tpu.memory_space<vmem>>, vector<1x512xf32>
    tpu.vector_store %arg7[%c0_9, %c0_10], %15 {strides = array<i32>} : memref<1x512xf32, #tpu.memory_space<vmem>>, vector<1x512xf32>,
    %c0_i32_11 = arith.constant 0 : i32
    %17 = arith.cmpi eq, %arg1, %c0_i32_11 : i32
    %18 = arith.extui %17 : i1 to i32
    %c0_i32_12 = arith.constant 0 : i32
    %19 = arith.cmpi ne, %18, %c0_i32_12 : i32
    scf.if %19 {
      %c0_13 = arith.constant 0 : index
      %c0_14 = arith.constant 0 : index
      %20 = vector.load %arg7[%c0_13, %c0_14] : memref<1x512xf32, #tpu.memory_space<vmem>>, vector<1x512xf32>
      %21 = vector.shape_cast %20 : vector<1x512xf32> to vector<1x1x512xf32>
      %cst_15 = arith.constant dense<0.000000e+00> : vector<1xf32>
      %22 = vector.multi_reduction <add>, %21, %cst_15 [1, 2] : vector<1x1x512xf32> to vector<1xf32>
      %23 = vector.shape_cast %22 : vector<1xf32> to vector<1x1x1xf32>
      %24 = vector.extract %23[0, 0, 0] : f32 from vector<1x1x1xf32>
      %c0_16 = arith.constant 0 : index
      %c0_17 = arith.constant 0 : index
      %25 = memref.load %arg8[%c0_16, %c0_17] : memref<1x1xf32, #tpu.memory_space<smem>>
      %cst_18 = arith.constant 5.000000e-04 : f32
      %26 = arith.mulf %cst_18, %24 : f32
      %27 = arith.addf %25, %26 : f32
      %cst_19 = arith.constant 2.000000e+00 : f32
      %28 = arith.divf %27, %cst_19 : f32
      %29 = vector.broadcast %28 : f32 to vector<8x128xf32>
      %c0_20 = arith.constant 0 : index
      %c0_21 = arith.constant 0 : index
      %30 = vector.load %arg6[%c0_20, %c0_21] : memref<8x128xf32, #tpu.memory_space<vmem>>, vector<8x128xf32>
      tpu.vector_store %arg6[%c0_20, %c0_21], %29 {strides = array<i32>} : memref<8x128xf32, #tpu.memory_space<vmem>>, vector<8x128xf32>,
    } else {
    }
    return
  }
  func.func @transform_0(%arg0: i32, %arg1: i32) -> (i32, i32) {
    %c0_i32 = arith.constant 0 : i32
    %c0_i32_0 = arith.constant 0 : i32
    %c0_i32_1 = arith.constant 0 : i32
    return %c0_i32, %c0_i32_0 : i32, i32
  }
  func.func @transform_1(%arg0: i32, %arg1: i32) -> (i32, i32) {
    %c0_i32 = arith.constant 0 : i32
    %c0_i32_0 = arith.constant 0 : i32
    %c0_i32_1 = arith.constant 0 : i32
    return %c0_i32, %c0_i32_0 : i32, i32
  }
  func.func @transform_2(%arg0: i32, %arg1: i32) -> (i32, i32) {
    %c1_i32 = arith.constant 1 : i32
    %0 = arith.muli %arg0, %c1_i32 : i32
    %1 = arith.addi %0, %arg1 : i32
    %c0_i32 = arith.constant 0 : i32
    %c0_i32_0 = arith.constant 0 : i32
    return %c0_i32, %1 : i32, i32
  }
  func.func @transform_3(%arg0: i32, %arg1: i32) -> (i32, i32) {
    %c1_i32 = arith.constant 1 : i32
    %0 = arith.muli %arg0, %c1_i32 : i32
    %1 = arith.addi %0, %arg1 : i32
    %c0_i32 = arith.constant 0 : i32
    %c0_i32_0 = arith.constant 0 : i32
    return %c0_i32, %1 : i32, i32
  }
  func.func @transform_4(%arg0: i32, %arg1: i32) -> (i32, i32) {
    %c0_i32 = arith.constant 0 : i32
    %c0_i32_0 = arith.constant 0 : i32
    return %arg0, %c0_i32 : i32, i32
  }
}

</mosaic_0001>

<bundles_post_ra>
// kernel: tpu_custom_call.1
= control target key start
LH: loop header
LB: loop body
LE: loop exit
PB: predicated region body
PF: predicated region fallthrough
CT: control target
= control target key end

     0   :  { %s1187_s0 = inlined_call_operand.hbm [shape: f32[2,10], index: 0, kind: input, shape index: {}]   ;;  %s1188_s1 = inlined_call_operand.vmem [shape: f32[2,10], index: 1, kind: input, shape index: {}]   ;;  %s1189_s2 = inlined_call_operand.hbm [shape: f32[2,1024], index: 2, kind: input, shape index: {}]   ;;  %s1190_s3 = inlined_call_operand.hbm [shape: f32[2,1024], index: 3, kind: input, shape index: {}]   ;;  %s1191_s4 = inlined_call_operand.hbm [shape: f32[16,128], index: 4, kind: output, shape index: {}]  }
   0x1   :  { %1197 = sst [smem:[#allocation14_spill]] %s1189_s2 }
   0x2   :  { %9 = vsyncpa [#allocation5], 0 }
   0x3   :  { %10 = vsyncpa [#allocation8], 0 }
   0x4   :  { %12 = vsyncpa [#allocation8 + $0x1], 0 }
   0x5   :  { %13 = vsyncpa [#allocation6], 0 }
   0x6   :  { %15 = vsyncpa [#allocation6 + $0x1], 0  ;;  %s913_s15 = smov 0   ;;  %s915_s16 = smov 0  }
   0x7   :  { %s917_s17 = smov 0   ;;  %s919_s18 = smov 0  }
   0x8   :  { %s921_s19 = smov 0   ;;  %s923_s20 = smov 0  }
   0x9 LB: > { %s33_s21 = sadd.s32 1, %s874_s19  ;;  %s84_s22 = sadd.s32 1, %s866_s17  ;;  %s878_s20 = sphi %s923_s20, %s21_s20   ;;  %s874_s19 = sphi %s921_s19, %s1221_s19   ;;  %s870_s18 = sphi %s919_s18, %s1220_s18   ;;  %s866_s17 = sphi %s917_s17, %s1219_s17   ;;  %s862_s16 = sphi %s915_s16, %s1218_s16   ;;  %s858_s15 = sphi %s913_s15, %s1217_s15  }
   0xa   : > { %p35_p0 = scmp.ge.s32.totalorder %s33_s21, 2  ;;  %p91_p1 = scmp.ne.s32.totalorder %s866_s17, %s862_s16 }
   0xb   : > { %p92_p2 = scmp.eq.s32.totalorder %s878_s20, 0  ;;  %p648_p5 = scmp.lt.s32.totalorder %s878_s20, 2 }
   0xc   : > { %s1223_s21 = smov (%p35_p0, %s33_s21), 0  ;;  %s189_s24 = sand.u32 1, %s878_s20  }
   0xd   : > { %p93_p4 = por %p92_p2, %p91_p1  ;;  %s81_s23 = ssub.s32 %s874_s19, %s1223_s21 }
   0xe   : > { %p82_p6 = scmp.eq.s32.totalorder %s81_s23, 0  ;;  %s191_s25 = sand.u32 1, %s866_s17  }
   0xf   : > { %s615_s26 = sshll.u32 %s874_s19, 7  ;;  %s963_s28 = sshll.u32 %s191_s25, 3 }
  0x10   : > { %s961_s27 = scalar_select %p82_p6, %s866_s17, %s84_s22  }
  0x11   : > { %s1198_s2 = sld [smem:[#allocation14_spill]]  ;;  %p972_p7 = pnand %p648_p5, %p93_p4 }
  0x12   : > { %s193_s7 = scalar_lea.vmem [#allocation7], %s963_s28  ;;  %s979_s9 = scalar_lea.sflag [#allocation8], %s189_s24 }
  0x13   : > { %s202_s8 = sshll.u32 %s193_s7, 4  ;;  %p706_p9 = pneg %p972_p7  ;;  %s977_s8 = int_to_ptr.vmem [resolvable:$true] %s202_s8 }
  0x17   : > { %s970_s5 = scalar_lea.hbm %s1198_s2, %s615_s26  ;;  %s709_s13 = scalar_lea.hbm %s1198_s2, 256 }
  0x18   : > { %s704_s10 = scalar_lea.hbm %s970_s5, 128  ;;  %p710_p12 = scmp.lt.u32.totalorder %s970_s5, %s1198_s2 }
  0x19   : > { %p705_p8 = scmp.ne.s32.totalorder %s970_s5, %s704_s10  ;;  %p711_p13 = scmp.lt.u32.totalorder %s709_s13, %s704_s10 }
  0x1a   : > { %p713_p2 = scmp.lt.u32.totalorder %s704_s10, %s970_s5 }
  0x1b   : > { %p707_p10 = pnand %p706_p9, %p705_p8  ;;  %p712_p0 = por %p711_p13, %p710_p12 }
  0x1d   : > { %p708_p11 = pneg %p707_p10  ;;  %p714_p4 = por %p713_p2, %p712_p0 }
  0x1f   : > { %p715_p5 = pnand %p714_p4, %p708_p11 }
  0x21   : > { %718 = shalt.err (!%p715_p5)
}
  0x22   : > { %s719_s23 = scalar_lea.vmem %s977_s8, 128  ;;  %s880_s24 = smov [#allocation7]  }
  0x23   : > { %p720_p6 = scmp.ne.s32.totalorder %s977_s8, %s719_s23  ;;  %s724_s25 = sshll.u32 %s880_s24, 4  ;;  %s725_s25 = int_to_ptr.vmem [resolvable:$false] %s724_s25 }
  0x24   : > { %s726_s29 = scalar_lea.vmem %s725_s25, 256  ;;  %p727_p3 = scmp.lt.s32.totalorder %s977_s8, %s725_s25 }
  0x25   : > { %p722_p8 = pnand %p720_p6, %p706_p9  ;;  %p728_p12 = scmp.lt.s32.totalorder %s726_s29, %s719_s23 }
  0x27   : > { %p723_p10 = pneg %p722_p8  ;;  %p729_p13 = por %p728_p12, %p727_p3 }
  0x29   : > { %p730_p0 = pnand %p729_p13, %p723_p10 }
  0x2b   : > { %733 = shalt.err (!%p730_p0)
}
  0x2c   : > { %639 = dma.hbm_to_vmem [thread:$0]  (!%p972_p7), %s970_s5, 128, %s977_s8, %s979_s9  }
  0x2d   : > { %s1008_s30 = sadd.s32 4294967295, %s878_s20   ;;  %s594_s7 = sadd.s32 4294967294, %s878_s20  }
  0x2e   : > { %p97_p3 = scmp.ne.s32.totalorder %s862_s16, %s858_s15  ;;  %p1192_p11 = scmp.eq.s32.totalorder %s1008_s30, 0 }
  0x2f   : > { %p149_p2 = scmp.eq.s32.totalorder %s1008_s30, 1  ;;  %p155_p4 = scmp.eq.s32.totalorder %s594_s7, 1 }
  0x30   : > { %p595_p5 = scmp.ge.s32.totalorder %s878_s20, 1  ;;  %p1018_p6 = por %p1192_p11, %p97_p3 }
  0x31   : > { %p1025_p8 = por %p149_p2, %p91_p1  ;;  %p1029_p10 = por %p155_p4, %p97_p3 }
  0x32   : > { %s1200_s10 = scalar_select %p1018_p6, 1, 0 }
  0x33   : > { %s1201_s5 = scalar_select %p1025_p8, 1, 0 }
  0x34   : > { %s1202_s8 = scalar_select %p1029_p10, 1, 0 }
  0x35   : > { %p162_p12 = scmp.lt.s32.totalorder %s878_s20, 3  ;;  %s1039_s13 = scalar_lea.hbm %s1190_s3, %s615_s26 }
  0x36   : > { %s881_s22 = smov [#allocation4]   ;;  %s213_s24 = scalar_lea.vmem [#allocation9], %s963_s28 }
  0x37   : > { %p1041_p13 = pnand %p595_p5, %p162_p12  ;;  %s1045_s23 = sshll.u32 %s881_s22, 4  ;;  %s176_s23 = int_to_ptr.vmem [resolvable:$true] %s1045_s23 }
  0x38   : > { %s222_s25 = sshll.u32 %s213_s24, 4  ;;  %s734_s29 = scalar_lea.hbm %s1039_s13, 128  ;;  %s223_s25 = int_to_ptr.vmem [resolvable:$true] %s222_s25 }
  0x39   : > { %s1203_s14 = scalar_select %p1041_p13, 1, 0 }
  0x3a   : > { %p735_p0 = scmp.ne.s32.totalorder %s1039_s13, %s734_s29  ;;  %s739_s11 = scalar_lea.hbm %s1190_s3, 256 }
  0x3b   : > { %p740_p4 = scmp.lt.u32.totalorder %s1039_s13, %s1190_s3  ;;  %p741_p5 = scmp.lt.u32.totalorder %s739_s11, %s734_s29 }
  0x3c   : > { %p737_p3 = pnand %p735_p0, %p706_p9  ;;  %p743_p11 = scmp.lt.u32.totalorder %s734_s29, %s1039_s13 }
  0x3d   : > { %p742_p12 = por %p741_p5, %p740_p4 }
  0x3e   : > { %p738_p2 = pneg %p737_p3 }
  0x3f   : > { %p744_p10 = por %p743_p11, %p742_p12 }
  0x41   : > { %p745_p1 = pnand %p744_p10, %p738_p2 }
  0x43   : > { %748 = shalt.err (!%p745_p1)
}
  0x44   : > { %s749_s28 = scalar_lea.vmem %s223_s25, 128  ;;  %s882_s22 = smov [#allocation9]  }
  0x45   : > { %p750_p8 = scmp.ne.s32.totalorder %s223_s25, %s749_s28  ;;  %s754_s24 = sshll.u32 %s882_s22, 4  ;;  %s755_s24 = int_to_ptr.vmem [resolvable:$false] %s754_s24 }
  0x46   : > { %s756_s26 = scalar_lea.vmem %s755_s24, 256  ;;  %p757_p6 = scmp.lt.s32.totalorder %s223_s25, %s755_s24 }
  0x47   : > { %p752_p0 = pnand %p750_p8, %p706_p9  ;;  %p758_p13 = scmp.lt.s32.totalorder %s756_s26, %s749_s28 }
  0x49   : > { %p753_p3 = pneg %p752_p0  ;;  %p759_p4 = por %p758_p13, %p757_p6 }
  0x4b   : > { %p760_p5 = pnand %p759_p4, %p753_p3 }
  0x4d   : > { %763 = shalt.err (!%p760_p5)
}
  0x4e   : > { %642 = dma.hbm_to_vmem [thread:$0]  (!%p972_p7), %s1039_s13, 128, %s223_s25, %s979_s9  }
  0x4f   : > { %p1204_p9 = scmp.eq.s32.totalorder %s1008_s30, 0  ;;  %p1205_p11 = scmp.ne.s32.totalorder %s1203_s14, 0 }
  0x50   : > { %s764_s11 = scalar_lea.hbm %s1187_s0, 32 }
  0x51   : > { %p1206_p8 = pneg %p1205_p11  ;;  %p765_p6 = scmp.ne.s32.totalorder %s1187_s0, %s764_s11 }
  0x52   : > { %p771_p2 = scmp.lt.u32.totalorder %s764_s11, %s1187_s0 }
  0x53   : > { %p1076_p10 = pnand %p1206_p8, %p1204_p9 }
  0x55   : > { %p766_p13 = pneg %p1076_p10 }
  0x57   : > { %p767_p7 = pnand %p766_p13, %p765_p6 }
  0x59   : > { %p768_p1 = pneg %p767_p7 }
  0x5b   : > { %p773_p12 = pnand %p771_p2, %p768_p1 }
  0x5d   : > { %776 = shalt.err (!%p773_p12)
}
  0x5e   : > { %s777_s25 = scalar_lea.vmem %s176_s23, 32  ;;  %p785_p5 = scmp.lt.s32.totalorder %s176_s23, %s176_s23 }
  0x5f   : > { %p778_p0 = scmp.ne.s32.totalorder %s176_s23, %s777_s25  ;;  %p786_p9 = scmp.lt.s32.totalorder %s777_s25, %s777_s25 }
  0x61   : > { %p780_p3 = pnand %p778_p0, %p766_p13  ;;  %p787_p8 = por %p786_p9, %p785_p5 }
  0x63   : > { %p781_p4 = pneg %p780_p3 }
  0x65   : > { %p788_p11 = pnand %p787_p8, %p781_p4 }
  0x67   : > { %791 = shalt.err (!%p788_p11)
}
  0x68   : > { %635 = dma.hbm_to_vmem [thread:$0]  (!%p1076_p10), %s1187_s0, 32, %s176_s23, [#allocation5]  }
  0x69   : > { %p1208_p6 = scmp.ne.s32.totalorder %s1203_s14, 0 }
  0x6a   : > { %p1209_p7 = scmp.eq.s32.totalorder (!%p1208_p6), %s1008_s30, 0 }
  0x6b   : > { %231 = sbr.rel (%p1208_p6) target bundleno = 615 (0x267), region = 36 }
  0x72   : > { %845 = dma.done.wait (%p1209_p7), [#allocation5], 32   ;;  %p1210_p13 = pmov %p1209_p7 }
  0x73   : > { %s237_s24 = sand.u32 1, %s1008_s30   ;;  %s239_s26 = sand.u32 1, %s862_s16  }
  0x74   : > { %847 = vsyncadd (%p1210_p13), [#allocation5], 4294967264  ;;  %s1106_s2 = sshll.u32 %s239_s26, 3  ;;  %s238_s23 = scalar_lea.sflag [#allocation8], %s237_s24 }
  0x75   : > { %s241_s29 = scalar_lea.vmem [#allocation7], %s1106_s2  ;;  %p1211_p11 = scmp.ne.s32.totalorder %s1200_s10, 0 }
  0x77   : > { %849 = dma.done.wait (%p1211_p11), %s238_s23, 256  }
  0x78   : > { %851 = vsyncadd (%p1211_p11), %s238_s23, 4294967040  ;;  %v288_v0 = vlaneseq  ;;  %s883_s14 = smov 0.0   ;;  %p295_p10 = scmp.eq.s32.totalorder %s870_s18, 0  ;;  %v884_v2 = vmov 0.0  }
  0x79   : > { %294 = sst [smem:[#allocation3]] %s883_s14  ;;  %s250_s30 = scalar_lea.vmem [#allocation9], %s1106_s2  ;;  %v300_v3 = vld [vmem:[#allocation4] sm:$0x3] (%p295_p10)  ;;  %v301_v4 = vld [vmem:[%s1188_s1] sm:$0x3] (%p295_p10) }
  0x7a   : > { %vm1113_vm0 = vcmp.lt.s32.totalorder %v288_v0, 512  ;;  %s279_s7 = scalar_lea.vmem [#allocation10], %s1106_s2  ;;  %299 = sbr.rel (!%p295_p10) target bundleno = 339 (0x153), region = 56  ;;  %v302_v5 = vsub.f32 (%p295_p10), 0.9, %v301_v4  ;;  %v308_v7 = vsub.f32 (%p295_p10), 1.0, %v300_v3 }
  0x7b   : > { %292 = vst.msk [vmem:[#allocation2] sm:$0xf] %vm1113_vm0, %v884_v2  ;;  %v610_v6 = vadd.f32 (%p295_p10), -0.1, %v301_v4  ;;  %vm313_vm1 = vcmask (%p295_p10), 74752  }
  0x7c   : > { %v303_v8 = vmax.f32 (%p295_p10), %v302_v5, 0.0  ;;  %v309_v10 = vmul.f32 (%p295_p10), 0.5, %v308_v7 }
  0x7d   : > { %v305_v9 = vmax.f32 (%p295_p10), %v610_v6, 0.0 }
  0x7e   : > { %v306_v11 = vmul.f32 (%p295_p10), %v303_v8, %v300_v3 }
  0x7f   : > { %v310_v12 = vmul.f32 (%p295_p10), %v309_v10, %v305_v9 }
  0x80   : > { %v307_v13 = vmul.f32 (%p295_p10), %v306_v11, %v303_v8 }
  0x81   : > { %v311_v14 = vmul.f32 %v310_v12, %v305_v9 }
  0x83   : > { %v312_v15 = vadd.f32 %v311_v14, %v307_v13 }
  0x85   : > { %v314_v16 = vsel %vm313_vm1, %v312_v15, 0.0 }
  0x86   : > { %315 = vadd.xlane.f32.xlu0 %v314_v16 }
 0x113   : > { %v316_v17 = vpop.xlane.xlu0 %315 }
 0x114   : > { %v317_v18 = vrot.slane %v316_v17, 4 }
 0x116   : > { %v318_v19 = vadd.f32 %v317_v18, %v316_v17 }
 0x118   : > { %v319_v20 = vrot.slane %v318_v19, 2 }
 0x11a   : > { %v320_v21 = vadd.f32 %v319_v20, %v318_v19 }
 0x11c   : > { %v321_v22 = vrot.slane %v320_v21, 1 }
 0x11e   : > { %v322_v23 = vadd.f32 %v321_v22, %v320_v21 }
 0x120   : > { %618 = vpush %v322_v23 }
 0x151   : > { %s619_s6 = spop %618 }
 0x152   : > { %325 = sst [smem:[#allocation3]] %s619_s6 }
 0x153 PF: > { %v326_v24 = vld [vmem:[%s250_s30] sm:$0xff]  ;;  %v327_v25 = vld [vmem:[%s241_s29] sm:$0xff]  ;;  %v885_v27 = vmov 1983009808   ;;  %v337_v29 = vshrl.u32 %v288_v0, 7  ;;  %vm353_vm2 = vcmask 1041408  }
 0x154   : > { %v328_v26 = vsub.f32 %v326_v24, %v327_v25  ;;  %v334_v28 = vunpack.c.l.s4 %v885_v27  ;;  %v886_v48 = vmov 1966171168   ;;  %v329_v12 = vld [vmem:[#allocation2] sm:$0xf]  ;;  %vm442_vm3 = vcmask 1040384   ;;  %s459_s12 = sld [smem:[#allocation3]] }
 0x155   : > { %v389_v49 = vunpack.c.l.s4 %v886_v48  ;;  %v424_v15 = vsub.s32 0, %v337_v29  ;;  %v428_v16 = vsub.s32 1, %v337_v29  ;;  %v432_v17 = vsub.s32 2, %v337_v29  ;;  %s612_s25 = sshll.u32 %s870_s18, 7  ;;  %s481_s22 = sshll.u32 %s279_s7, 4  ;;  %s1137_s22 = int_to_ptr.vmem [resolvable:$true] %s481_s22 }
 0x156   : > { %v330_v30 = vmul.f32 %v328_v26, %v328_v26  ;;  %v335_v31 = vunpack.c.0.s8 %v334_v28  ;;  %v436_v18 = vsub.s32 3, %v337_v29  ;;  %s1135_s14 = scalar_lea.hbm %s1191_s4, %s612_s25  ;;  %s468_s30 = scalar_lea.sflag [#allocation6], %s239_s26 }
 0x157   : > { %v390_v58 = vunpack.c.0.s8 %v389_v49  ;;  %s792_s18 = scalar_lea.vmem %s1137_s22, 128  ;;  %p1214_p2 = scmp.ne.s32.totalorder %s1201_s5, 0 }
 0x158   : > { %v332_v32 = vcombine.high %v330_v30, %v330_v30  ;;  %v338_v33 = vsub.s32 %v335_v31, %v337_v29  ;;  %p793_p1 = scmp.ne.s32.totalorder %s1137_s22, %s792_s18  ;;  %s887_s10 = smov [#allocation10]  }
 0x159   : > { %v393_v6 = vsub.s32 %v390_v58, %v337_v29  ;;  %s796_s11 = sshll.u32 %s887_s10, 4  ;;  %s797_s11 = int_to_ptr.vmem [resolvable:$false] %s796_s11 }
 0x15a   : > { %v339_v34 = vrot.slane %v330_v30, %v338_v33  ;;  %v346_v35 = vrot.slane %v332_v32, %v338_v33  ;;  %p794_p12 = pnand %p793_p1, %p1214_p2  ;;  %s798_s6 = scalar_lea.vmem %s797_s11, 256 }
 0x15b   : > { %p799_p3 = scmp.lt.s32.totalorder %s1137_s22, %s797_s11  ;;  %p800_p4 = scmp.lt.s32.totalorder %s798_s6, %s792_s18 }
 0x15c   : > { %v347_v36 = vcombine.high %v339_v34, %v339_v34  ;;  %v348_v37 = vcombine.high %v346_v35, %v346_v35  ;;  %v354_v38 = vsel %vm353_vm2, %v339_v34, 0.0  ;;  %v368_v39 = vsel %vm353_vm2, %v346_v35, 0.0  ;;  %p795_p0 = pneg %p794_p12 }
 0x15d   : > { %v355_v40 = vrot.slane %v354_v38, 4  ;;  %v369_v41 = vrot.slane %v368_v39, 4  ;;  %p801_p5 = por %p800_p4, %p799_p3 }
 0x15e   : > { %v361_v42 = vsel %vm353_vm2, %v347_v36, 0.0  ;;  %v375_v43 = vsel %vm353_vm2, %v348_v37, 0.0 }
 0x15f   : > { %v356_v44 = vadd.f32 %v355_v40, %v354_v38  ;;  %v362_v45 = vrot.slane %v361_v42, 4  ;;  %v370_v46 = vadd.f32 %v369_v41, %v368_v39  ;;  %v376_v47 = vrot.slane %v375_v43, 4  ;;  %p802_p9 = pnand %p801_p5, %p795_p0 }
 0x161   : > { %v357_v50 = vrot.slane %v356_v44, 2  ;;  %v363_v51 = vadd.f32 %v362_v45, %v361_v42  ;;  %v371_v52 = vrot.slane %v370_v46, 2  ;;  %v377_v53 = vadd.f32 %v376_v47, %v375_v43 }
 0x163   : > { %v358_v54 = vadd.f32 %v357_v50, %v356_v44  ;;  %v364_v55 = vrot.slane %v363_v51, 2  ;;  %v372_v56 = vadd.f32 %v371_v52, %v370_v46  ;;  %v378_v57 = vrot.slane %v377_v53, 2 }
 0x165   : > { %v359_v59 = vrot.slane %v358_v54, 1  ;;  %v365_v60 = vadd.f32 %v364_v55, %v363_v51  ;;  %v373_v61 = vrot.slane %v372_v56, 1  ;;  %v379_v62 = vadd.f32 %v378_v57, %v377_v53 }
 0x167   : > { %v360_v63 = vadd.f32 %v359_v59, %v358_v54  ;;  %v366_v0 = vrot.slane %v365_v60, 1  ;;  %v374_v2 = vadd.f32 %v373_v61, %v372_v56  ;;  %v380_v3 = vrot.slane %v379_v62, 1 }
 0x169   : > { %v367_v4 = vadd.f32 %v366_v0, %v365_v60  ;;  %v381_v5 = vadd.f32 %v380_v3, %v379_v62 }
 0x16b   : > { %v386_v7 = vcombine.low %v360_v63, %v367_v4  ;;  %v387_v8 = vcombine.low %v374_v2, %v381_v5 }
 0x16d   : > { %v394_v9 = vrot.slane %v386_v7, %v393_v6  ;;  %v401_v10 = vrot.slane %v387_v8, %v393_v6 }
 0x16f   : > { %v402_v11 = vcombine.low %v394_v9, %v401_v10 }
 0x171   : > { %v409_v13 = vrot.slane %v402_v11, %v393_v6 }
 0x173   : > { %v411_v14 = vadd.f32 %v409_v13, %v329_v12 }
 0x175   : > { %416 = vst.msk [vmem:[#allocation2] sm:$0xf] %vm1113_vm0, %v411_v14 }
 0x17c   : > { %v420_v19 = vld [vmem:[#allocation2] sm:$0xf] }
 0x17d   : > { %v425_v20 = vrot.slane %v420_v19, %v424_v15  ;;  %v429_v21 = vrot.slane %v420_v19, %v428_v16  ;;  %v433_v22 = vrot.slane %v420_v19, %v432_v17  ;;  %v437_v23 = vrot.slane %v420_v19, %v436_v18 }
 0x17f   : > { %v443_v24 = vsel %vm442_vm3, %v425_v20, 0.0  ;;  %v444_v25 = vsel %vm442_vm3, %v429_v21, 0.0  ;;  %v446_v26 = vsel %vm442_vm3, %v433_v22, 0.0  ;;  %v448_v28 = vsel %vm442_vm3, %v437_v23, 0.0 }
 0x180   : > { %v445_v27 = vadd.f32 %v444_v25, %v443_v24 }
 0x182   : > { %v447_v30 = vadd.f32 %v446_v26, %v445_v27 }
 0x184   : > { %v449_v1 = vadd.f32 %v448_v28, %v447_v30 }
 0x186   : > { %450 = vadd.xlane.f32.xlu0 %v449_v1 }
 0x213   : > { %v451_v31 = vpop.xlane.xlu0 %450 }
 0x214   : > { %v452_v32 = vrot.slane %v451_v31, 4 }
 0x216   : > { %v453_v33 = vadd.f32 %v452_v32, %v451_v31 }
 0x218   : > { %v454_v29 = vrot.slane %v453_v33, 2 }
 0x21a   : > { %v455_v34 = vadd.f32 %v454_v29, %v453_v33 }
 0x21c   : > { %v456_v35 = vrot.slane %v455_v34, 1 }
 0x21e   : > { %v457_v36 = vadd.f32 %v456_v35, %v455_v34 }
 0x220   : > { %620 = vpush %v457_v36 }
 0x251   : > { %s621_s9 = spop %620 }
 0x252   : > { %s460_s13 = smul.f32 0.0005, %s621_s9 }
 0x254   : > { %s461_s28 = sadd.f32 %s460_s13, %s459_s12 }
 0x256   : > { %s464_s24 = smul.f32 0.5, %s461_s28 }
 0x258   : > { %v465_v37 = vstv %s464_s24 }
 0x259   : > { %466 = vst [vmem:[%s279_s7] sm:$0xff] %v465_v37 }
 0x25a   : > { %805 = shalt.err (!%p802_p9)
}
 0x25b   : > { %s806_s26 = scalar_lea.hbm %s1135_s14, 128  ;;  %s810_s12 = scalar_lea.hbm %s1191_s4, 256 }
 0x25c   : > { %p807_p8 = scmp.ne.s32.totalorder %s1135_s14, %s806_s26  ;;  %p811_p13 = scmp.lt.u32.totalorder %s1135_s14, %s1191_s4 }
 0x25d   : > { %p812_p11 = scmp.lt.u32.totalorder %s810_s12, %s806_s26  ;;  %p814_p1 = scmp.lt.u32.totalorder %s806_s26, %s1135_s14 }
 0x25e   : > { %p808_p6 = pnand %p807_p8, %p1214_p2 }
 0x25f   : > { %p813_p10 = por %p812_p11, %p811_p13 }
 0x260   : > { %p809_p7 = pneg %p808_p6 }
 0x261   : > { %p815_p12 = por %p814_p1, %p813_p10 }
 0x263   : > { %p816_p0 = pnand %p815_p12, %p809_p7 }
 0x265   : > { %819 = shalt.err (!%p816_p0)
}
 0x266   : > { %630 = dma.vmem_to_hbm [thread:$0]  (%p1214_p2), %s1137_s22, 128, %s1135_s14, %s468_s30  }
 0x267 PF: > { %s493_s25 = sand.u32 1, %s858_s15   ;;  %p1215_p3 = scmp.ne.s32.totalorder %s1202_s8, 0 }
 0x268   : > { %p1216_p4 = scmp.ge.s32.totalorder %s878_s20, 2  ;;  %s494_s28 = scalar_lea.sflag [#allocation6], %s493_s25 }
 0x26a   : > { %p644_p5 = pnand %p1216_p4, %p1215_p3 }
 0x26c   : > { %853 = dma.done.wait (!%p644_p5), %s494_s28, 128  }
 0x26d   : > { %855 = vsyncadd (!%p644_p5), %s494_s28, 4294967168  ;;  %s21_s20 = sadd.s32 1, %s878_s20   ;;  %s1217_s15 = smov %s862_s16 }
 0x26e   : > { %p18_p9 = scmp.ge.s32.totalorder %s21_s20, 4   ;;  %s1218_s16 = smov %s866_s17 }
 0x26f   : > { %s1219_s17 = smov %s961_s27  ;;  %s1220_s18 = smov %s874_s19 }
 0x270   : > { %s1221_s19 = smov %s1223_s21  ;;  %20 = sbr.rel (!%p18_p9) target bundleno = 9 (0x9), region = 111 }
 0x277   :  { %499 = vsyncpa [#allocation5], 1 }
 0x278   :  { %501 = vsyncpa [#allocation5 + $0x1], 1 }
 0x279   :  { %502 = vsyncpa [#allocation8], 1 }
 0x27a   :  { %504 = vsyncpa [#allocation8 + $0x1], 1 }
 0x27b   :  { %505 = vsyncpa [#allocation6], 1 }
 0x27c   :  { %507 = vsyncpa [#allocation6 + $0x1], 1 }

</bundles_post_ra>
